<compile_context>
chip_gen: v5e
topology: v5e:2x2
jax: 0.10.0
libtpu: 0.0.40
codegen_flags: <defaults>
</compile_context>

<pallas_src>
import jax
import jax.numpy as jnp
from jax.experimental import pallas as pl
from jax.experimental.pallas import tpu as pltpu

OUT_PAD = 128  # lane-dense padding for the width-1 final output


def _vmem_spec():
    return pl.BlockSpec(memory_space=pltpu.MemorySpace.VMEM)


# ---------------- Fused forward kernel ----------------

def make_fused_kernel(num_applied_convs):
    """One kernel for the whole forward. All weights/activations are tiny and stay VMEM/vreg-resident.

    Arg order (refs): x0, norm_adj, mask_t, dec_w, dec_b,
                      [conv_w, conv_b] * num_applied_convs,
                      mp_w1, mp_b1, mp_w2_pad, mp_b2_pad, o_ref
    """

    def kernel(x0_ref, adj_ref, mask_ref, dec_w_ref, dec_b_ref, *refs):
        conv_refs = refs[: 2 * num_applied_convs]
        w1_ref, b1_ref, w2_ref, b2_ref, o_ref = refs[2 * num_applied_convs:]

        # --- decoder_input: Linear(N_max -> embedding_dim) ---
        # NOTE: f32 kept for exact parity with the reference; at larger feature dims,
        # cast MXU operands to bf16 (keep preferred_element_type=f32) on v6e/v7x.
        x = (
            jnp.dot(x0_ref[...], dec_w_ref[...], preferred_element_type=jnp.float32)
            + dec_b_ref[...]
        )

        # --- GCN layers (convs[:-1]) ---
        adj = adj_ref[...]  # normalized dense adjacency, loaded once, reused across layers
        for l in range(num_applied_convs):
            w = conv_refs[2 * l][...]
            b = conv_refs[2 * l + 1][...]
            h = jnp.dot(x, w, preferred_element_type=jnp.float32)
            x = jnp.maximum(
                jnp.dot(adj, h, preferred_element_type=jnp.float32) + b, 0.0
            )
            # TODO(synk): training-mode F.dropout would need pltpu.prng_random_bits;
            # identity here (eval mode).

        # --- global_max_pool (vectorized: one where + one max, single result) ---
        mask = mask_ref[...]                      # (N, G) one-hot membership, float 0/1
        neg = jnp.float32(-1e30)
        masked = jnp.where(mask[:, :, None] > 0.5, x[:, None, :], neg)  # (N, G, F)
        pooled = jnp.max(masked, axis=0)          # (G, F)

        # --- post_mp: Linear -> ReLU -> (Dropout=id) -> Linear (padded to 128 lanes) ---
        h1 = jnp.maximum(
            jnp.dot(pooled, w1_ref[...], preferred_element_type=jnp.float32) + b1_ref[...],
            0.0,
        )
        o_ref[...] = (
            jnp.dot(h1, w2_ref[...], preferred_element_type=jnp.float32) + b2_ref[...]
        )

    return kernel


# ---------------- Model glue (parameter setup, adjacency normalization, mask) ----------------

def init_params(key, max_num_nodes, embedding_dim, hidden_dim, num_layers):
    """Deterministic init mimicking PyTorch Linear default U(-1/sqrt(fan_in), +1/sqrt(fan_in))."""

    def lin(k, fan_in, fan_out):
        kw, kb = jax.random.split(k)
        bound = 1.0 / jnp.sqrt(jnp.float32(fan_in))
        w = jax.random.uniform(kw, (fan_in, fan_out), jnp.float32, -bound, bound)
        b = jax.random.uniform(kb, (1, fan_out), jnp.float32, -bound, bound)
        return w, b

    keys = jax.random.split(key, 3 + num_layers)
    params = {}
    params["dec_w"], params["dec_b"] = lin(keys[0], max_num_nodes, embedding_dim)

    conv_params = []
    in_dim = embedding_dim
    for l in range(num_layers):
        w, b = lin(keys[1 + l], in_dim, hidden_dim)
        conv_params.append((w, b))
        in_dim = hidden_dim
    params["conv_params"] = conv_params

    params["mp_w1"], params["mp_b1"] = lin(keys[1 + num_layers], hidden_dim, hidden_dim)
    params["mp_w2"], params["mp_b2"] = lin(keys[2 + num_layers], hidden_dim, 1)
    return params


def gnn_stack_forward(adj, subgraph_idx, edges, params, num_graphs):
    B, C, _, n_max = adj.shape
    x0 = adj.reshape(-1, n_max).astype(jnp.float32)        # (num_nodes, N_max)
    num_nodes = x0.shape[0]

    # ---- Kernel-independent prep (plain XLA, off the Pallas critical path) ----
    # GCN normalized dense adjacency: D^{-1/2} (A + I) D^{-1/2}
    src = edges[:, 0]
    dst = edges[:, 1]
    a = jnp.zeros((num_nodes, num_nodes), jnp.float32).at[dst, src].set(1.0)
    a_hat = a + jnp.eye(num_nodes, dtype=jnp.float32)
    dinv = jax.lax.rsqrt(jnp.sum(a_hat, axis=1))           # self-loops guarantee deg >= 1
    norm_adj = dinv[:, None] * a_hat * dinv[None, :]

    # one-hot node->graph membership for global_max_pool (supports arbitrary subgraph_idx)
    mask_t = (subgraph_idx[:, None] == jnp.arange(num_graphs)[None, :]).astype(jnp.float32)

    # Pad the final Linear(hidden -> 1) to 128 output lanes so the kernel's only output
    # store is unmasked / lane-dense; the extra columns are exact zeros and sliced off below.
    hid = params["mp_w1"].shape[1]
    w2p = jnp.zeros((hid, OUT_PAD), jnp.float32).at[:, :1].set(params["mp_w2"])
    b2p = jnp.zeros((1, OUT_PAD), jnp.float32).at[:, :1].set(params["mp_b2"])

    # Faithful to the reference: only convs[:-1] are applied.
    applied = params["conv_params"][:-1]
    conv_flat = []
    for (w, b) in applied:
        conv_flat += [w, b]

    num_inputs = 5 + len(conv_flat) + 4
    kernel = make_fused_kernel(len(applied))

    # Gridless single-invocation call: everything fits easily in VMEM at these shapes.
    # TODO(synk): when scaling num_nodes, tile norm_adj over node-row blocks with a grid
    # (BlockSpec((tm, N)), reduction axis last, dimension_semantics=("parallel", ...)) so it
    # fits v7x's 64 MiB VMEM and shards across its two TensorCores.
    out_pad = pl.pallas_call(
        kernel,
        out_shape=jax.ShapeDtypeStruct((num_graphs, OUT_PAD), jnp.float32),
        in_specs=[_vmem_spec()] * num_inputs,
        out_specs=_vmem_spec(),
    )(
        x0, norm_adj, mask_t,
        params["dec_w"], params["dec_b"],
        *conv_flat,
        params["mp_w1"], params["mp_b1"], w2p, b2p,
    )
    return out_pad[:, :1]                                   # (num_graphs, 1)


# ---------------- Main ----------------

if __name__ == "__main__":
    # config: max_num_nodes=16, embedding_dim=32, hidden_dim=32, num_GraphGNN_layers=2,
    #         model_type='GCN' (num_head forced to 1), dimension_reduce=True, use_one_feature=False
    B, C, N_MAX = 2, 1, 16
    EMB, HID, NUM_LAYERS = 32, 32, 2
    NUM_GRAPHS = B * C
    NUM_NODES = B * C * N_MAX

    key = jax.random.PRNGKey(0)
    k_adj, k_param = jax.random.split(key)

    # data['adj'] : (B, C, N_max, N_max) 0/1 adjacency features
    adj = jax.random.bernoulli(k_adj, 0.3, (B, C, N_MAX, N_MAX)).astype(jnp.float32)

    # data['subgraph_idx'] : graph id per node (contiguous blocks of N_max nodes)
    subgraph_idx = jnp.repeat(jnp.arange(NUM_GRAPHS, dtype=jnp.int32), N_MAX)

    # data['edges'] : (E, 2) directed edges — complete graph within each subgraph (no self loops)
    edge_list = []
    for g in range(NUM_GRAPHS):
        base = g * N_MAX
        for i in range(N_MAX):
            for j in range(N_MAX):
                if i != j:
                    edge_list.append((base + i, base + j))
    edges = jnp.array(edge_list, dtype=jnp.int32)

    params = init_params(k_param, N_MAX, EMB, HID, NUM_LAYERS)

    out = gnn_stack_forward(adj, subgraph_idx, edges, params, NUM_GRAPHS)
    out = jax.block_until_ready(out)
    assert out.shape == (NUM_GRAPHS, 1) and out.dtype == jnp.float32
    print("KERNEL_OK")
</pallas_src>

<mosaic_0001>
module attributes {stable_mosaic.version = 11 : i64} {
  func.func @kernel(%arg0: memref<32x16xf32, #tpu.memory_space<vmem>>, %arg1: memref<32x32xf32, #tpu.memory_space<vmem>>, %arg2: memref<32x2xf32, #tpu.memory_space<vmem>>, %arg3: memref<16x32xf32, #tpu.memory_space<vmem>>, %arg4: memref<1x32xf32, #tpu.memory_space<vmem>>, %arg5: memref<32x32xf32, #tpu.memory_space<vmem>>, %arg6: memref<1x32xf32, #tpu.memory_space<vmem>>, %arg7: memref<32x32xf32, #tpu.memory_space<vmem>>, %arg8: memref<1x32xf32, #tpu.memory_space<vmem>>, %arg9: memref<32x128xf32, #tpu.memory_space<vmem>>, %arg10: memref<1x128xf32, #tpu.memory_space<vmem>>, %arg11: memref<2x128xf32, #tpu.memory_space<vmem>>) attributes {dimension_semantics = [], scalar_prefetch = 0 : i64, scratch_operands = 0 : i64, tpu.core_type = #tpu.core_type<tc>} {
    %c0 = arith.constant 0 : index
    %c0_0 = arith.constant 0 : index
    %0 = vector.load %arg0[%c0, %c0_0] : memref<32x16xf32, #tpu.memory_space<vmem>>, vector<32x16xf32>
    %c0_1 = arith.constant 0 : index
    %c0_2 = arith.constant 0 : index
    %1 = vector.load %arg3[%c0_1, %c0_2] : memref<16x32xf32, #tpu.memory_space<vmem>>, vector<16x32xf32>
    %cst = arith.constant dense<0.000000e+00> : vector<32x32xf32>
    %2 = tpu.matmul %0, %1, %cst {dimension_numbers = #tpu.dot_dimension_numbers<[1], [0], [0], [1], [0, 0, 1, 1], [], []>} : vector<32x16xf32>, vector<16x32xf32>, vector<32x32xf32> -> vector<32x32xf32>
    %c0_3 = arith.constant 0 : index
    %c0_4 = arith.constant 0 : index
    %3 = vector.load %arg4[%c0_3, %c0_4] : memref<1x32xf32, #tpu.memory_space<vmem>>, vector<1x32xf32>
    %4 = vector.broadcast %3 : vector<1x32xf32> to vector<32x32xf32>
    %5 = arith.addf %2, %4 : vector<32x32xf32>
    %c0_5 = arith.constant 0 : index
    %c0_6 = arith.constant 0 : index
    %6 = vector.load %arg1[%c0_5, %c0_6] : memref<32x32xf32, #tpu.memory_space<vmem>>, vector<32x32xf32>
    %c0_7 = arith.constant 0 : index
    %c0_8 = arith.constant 0 : index
    %7 = vector.load %arg5[%c0_7, %c0_8] : memref<32x32xf32, #tpu.memory_space<vmem>>, vector<32x32xf32>
    %c0_9 = arith.constant 0 : index
    %c0_10 = arith.constant 0 : index
    %8 = vector.load %arg6[%c0_9, %c0_10] : memref<1x32xf32, #tpu.memory_space<vmem>>, vector<1x32xf32>
    %cst_11 = arith.constant dense<0.000000e+00> : vector<32x32xf32>
    %9 = tpu.matmul %5, %7, %cst_11 {dimension_numbers = #tpu.dot_dimension_numbers<[1], [0], [0], [1], [0, 0, 1, 1], [], []>} : vector<32x32xf32>, vector<32x32xf32>, vector<32x32xf32> -> vector<32x32xf32>
    %cst_12 = arith.constant dense<0.000000e+00> : vector<32x32xf32>
    %10 = tpu.matmul %6, %9, %cst_12 {dimension_numbers = #tpu.dot_dimension_numbers<[1], [0], [0], [1], [0, 0, 1, 1], [], []>} : vector<32x32xf32>, vector<32x32xf32>, vector<32x32xf32> -> vector<32x32xf32>
    %11 = vector.broadcast %8 : vector<1x32xf32> to vector<32x32xf32>
    %12 = arith.addf %10, %11 : vector<32x32xf32>
    %cst_13 = arith.constant 0.000000e+00 : f32
    %13 = vector.broadcast %cst_13 : f32 to vector<32x32xf32>
    %14 = arith.maximumf %12, %13 : vector<32x32xf32>
    %c0_14 = arith.constant 0 : index
    %c0_15 = arith.constant 0 : index
    %15 = vector.load %arg2[%c0_14, %c0_15] : memref<32x2xf32, #tpu.memory_space<vmem>>, vector<32x2xf32>
    %16 = vector.shape_cast %15 : vector<32x2xf32> to vector<32x2x1xf32>
    %cst_16 = arith.constant 5.000000e-01 : f32
    %17 = vector.broadcast %cst_16 : f32 to vector<32x2x1xf32>
    %18 = arith.cmpf ogt, %16, %17 : vector<32x2x1xf32>
    %19 = vector.shape_cast %14 : vector<32x32xf32> to vector<32x1x32xf32>
    %cst_17 = arith.constant -1.000000e+30 : f32
    %20 = vector.shape_cast %18 : vector<32x2x1xi1> to vector<32x2x1xi1>
    %21 = vector.broadcast %20 : vector<32x2x1xi1> to vector<32x2x32xi1>
    %22 = vector.shape_cast %19 : vector<32x1x32xf32> to vector<32x1x32xf32>
    %23 = vector.broadcast %22 : vector<32x1x32xf32> to vector<32x2x32xf32>
    %24 = vector.broadcast %cst_17 : f32 to vector<32x2x32xf32>
    %25 = arith.select %21, %23, %24 : vector<32x2x32xi1>, vector<32x2x32xf32>
    %cst_18 = arith.constant dense<0xFF800000> : vector<2x32xf32>
    %26 = vector.multi_reduction <maximumf>, %25, %cst_18 [0] : vector<32x2x32xf32> to vector<2x32xf32>
    %c0_19 = arith.constant 0 : index
    %c0_20 = arith.constant 0 : index
    %27 = vector.load %arg7[%c0_19, %c0_20] : memref<32x32xf32, #tpu.memory_space<vmem>>, vector<32x32xf32>
    %cst_21 = arith.constant dense<0.000000e+00> : vector<2x32xf32>
    %28 = tpu.matmul %26, %27, %cst_21 {dimension_numbers = #tpu.dot_dimension_numbers<[1], [0], [0], [1], [0, 0, 1, 1], [], []>} : vector<2x32xf32>, vector<32x32xf32>, vector<2x32xf32> -> vector<2x32xf32>
    %c0_22 = arith.constant 0 : index
    %c0_23 = arith.constant 0 : index
    %29 = vector.load %arg8[%c0_22, %c0_23] : memref<1x32xf32, #tpu.memory_space<vmem>>, vector<1x32xf32>
    %30 = vector.broadcast %29 : vector<1x32xf32> to vector<2x32xf32>
    %31 = arith.addf %28, %30 : vector<2x32xf32>
    %cst_24 = arith.constant 0.000000e+00 : f32
    %32 = vector.broadcast %cst_24 : f32 to vector<2x32xf32>
    %33 = arith.maximumf %31, %32 : vector<2x32xf32>
    %c0_25 = arith.constant 0 : index
    %c0_26 = arith.constant 0 : index
    %34 = vector.load %arg9[%c0_25, %c0_26] : memref<32x128xf32, #tpu.memory_space<vmem>>, vector<32x128xf32>
    %cst_27 = arith.constant dense<0.000000e+00> : vector<2x128xf32>
    %35 = tpu.matmul %33, %34, %cst_27 {dimension_numbers = #tpu.dot_dimension_numbers<[1], [0], [0], [1], [0, 0, 1, 1], [], []>} : vector<2x32xf32>, vector<32x128xf32>, vector<2x128xf32> -> vector<2x128xf32>
    %c0_28 = arith.constant 0 : index
    %c0_29 = arith.constant 0 : index
    %36 = vector.load %arg10[%c0_28, %c0_29] : memref<1x128xf32, #tpu.memory_space<vmem>>, vector<1x128xf32>
    %37 = vector.broadcast %36 : vector<1x128xf32> to vector<2x128xf32>
    %38 = arith.addf %35, %37 : vector<2x128xf32>
    %c0_30 = arith.constant 0 : index
    %c0_31 = arith.constant 0 : index
    %39 = vector.load %arg11[%c0_30, %c0_31] : memref<2x128xf32, #tpu.memory_space<vmem>>, vector<2x128xf32>
    tpu.vector_store %arg11[%c0_30, %c0_31], %38 {strides = array<i32>} : memref<2x128xf32, #tpu.memory_space<vmem>>, vector<2x128xf32>,
    return
  }
}

</mosaic_0001>

<bundles_post_ra>
// kernel: tpu_custom_call.1
= control target key start
LH: loop header
LB: loop body
LE: loop exit
PB: predicated region body
PF: predicated region fallthrough
CT: control target
= control target key end

     0   :  { %16 = vsyncpa [#allocation3], 0  ;;  %s1297_s0 = inlined_call_operand.vmem [shape: f32[32,16], index: 0, kind: input, shape index: {}]   ;;  %s1298_s1 = inlined_call_operand.vmem [shape: f32[32,32], index: 1, kind: input, shape index: {}]   ;;  %s1299_s2 = inlined_call_operand.vmem [shape: f32[32,2], index: 2, kind: input, shape index: {}]   ;;  %s1300_s3 = inlined_call_operand.vmem [shape: f32[16,32], index: 3, kind: input, shape index: {}]   ;;  %s1301_s4 = inlined_call_operand.vmem [shape: f32[1,32], index: 4, kind: input, shape index: {}]   ;;  %s1302_s5 = inlined_call_operand.vmem [shape: f32[32,32], index: 5, kind: input, shape index: {}]   ;;  %s1303_s6 = inlined_call_operand.vmem [shape: f32[1,32], index: 6, kind: input, shape index: {}]   ;;  %s1304_s7 = inlined_call_operand.hbm [shape: f32[32,32], index: 7, kind: input, shape index: {}]   ;;  %s1305_s8 = inlined_call_operand.vmem [shape: f32[1,32], index: 8, kind: input, shape index: {}]   ;;  %s1306_s9 = inlined_call_operand.hbm [shape: f32[32,128], index: 9, kind: input, shape index: {}]   ;;  %s1307_s10 = inlined_call_operand.vmem [shape: f32[1,128], index: 10, kind: input, shape index: {}]   ;;  %s1308_s11 = inlined_call_operand.hbm [shape: f32[2,128], index: 11, kind: output, shape index: {}]  }
   0x1   :  { %17 = vsyncpa [#allocation6], 0 }
   0x2   :  { %18 = vsyncpa [#allocation4], 0  ;;  %s37_s19 = sshll.u32 %s1304_s7, 4  ;;  %s924_s20 = smov [#allocation2]   ;;  %s38_s19 = int_to_ptr.hbm [resolvable:$true] %s37_s19 }
   0x3   :  { %s39_s21 = sshll.u32 %s924_s20, 4  ;;  %s52_s24 = sshll.u32 %s1306_s9, 4  ;;  %s40_s21 = int_to_ptr.vmem [resolvable:$true] %s39_s21  ;;  %s53_s24 = int_to_ptr.hbm [resolvable:$true] %s52_s24 }
   0x4   :  { %s925_s25 = smov 128   ;;  %s926_s26 = smov 8  }
   0x5   :  { %45 = dma.hbm_to_vmem [thread:$0]  %s38_s19, 512, %s40_s21, [#allocation3], %s925_s25, %s925_s25, %s926_s26  }
   0x6   :  { %s927_s27 = smov [#allocation5]  }
   0x7   :  { %s54_s28 = sshll.u32 %s927_s27, 4  ;;  %s55_s28 = int_to_ptr.vmem [resolvable:$true] %s54_s28 }
   0x8   :  { %60 = dma.hbm_to_vmem [thread:$0]  %s53_s24, 512, %s55_s28, [#allocation6], %s925_s25, %s925_s25, %s926_s26  }
   0x9   :  { %918 = dma.done.wait [#allocation3], 512  }
   0xa   :  { %919 = vsyncadd [#allocation3], 4294966784 }
   0xb   :  { %920 = dma.done.wait [#allocation6], 512  }
   0xc   :  { %921 = vsyncadd [#allocation6], 4294966784  ;;  %v76_v0 = vld [vmem:[%s1300_s3 + $0x8] sm:$0xff]  ;;  %v75_v1 = vld [vmem:[%s1300_s3] sm:$0xff]  ;;  %vm81_vm0 = vcmask 130048   ;;  %v227_v10 = vlaneseq  ;;  %vm1309_vm1 = vcmask 261120  }
   0xd   :  { %108 = vmatpush.msra.mxu0 %v76_v0  ;;  %v71_v2 = vld [vmem:[%s1297_s0] sm:$0xff]  ;;  %v130_v3 = vld [vmem:[%s1302_s5 + $0x18] sm:$0xff]  ;;  %v129_v4 = vld [vmem:[%s1302_s5 + $0x10] sm:$0xff]  ;;  %vm674_vm10 = vcmask 254976   ;;  %s928_s23 = smov [#allocation7]   ;;  %s809_s27 = sshll.u32 %s1308_s11, 4  ;;  %s810_s27 = int_to_ptr.hbm [resolvable:$true] %s809_s27 }
   0xe   :  { %157 = vmatpush.msra.mxu1 %v130_v3  ;;  %v72_v5 = vld [vmem:[%s1297_s0 + $0x8] sm:$0xff]  ;;  %v73_v6 = vld [vmem:[%s1297_s0 + $0x10] sm:$0xff]  ;;  %v74_v7 = vld [vmem:[%s1297_s0 + $0x18] sm:$0xff]  ;;  %v228_v12 = vshrl.u32 %v227_v10, 7  ;;  %s807_s24 = sshll.u32 %s928_s23, 4  ;;  %s808_s24 = int_to_ptr.vmem [resolvable:$true] %s807_s24 }
   0xf   :  { %109 = vmatpush.msra.mxu0 %v75_v1  ;;  %v128_v8 = vld [vmem:[%s1302_s5 + $0x8] sm:$0xff]  ;;  %v127_v9 = vld [vmem:[%s1302_s5] sm:$0xff]  ;;  %v224_v38 = vld [vmem:[%s1299_s2 + $0x10] sm:$0xff] }
  0x10   :  { %820 = vmatmul.msk.f32.vlgmr.msra.gmra.mxu0 %vm81_vm0, %v71_v2  ;;  %158 = vmatpush.msra.mxu1 %v129_v4  ;;  %v842_v11 = vld [vmem:[%s1301_s4] ss:$0 sm:$0xff]  ;;  %v223_v28 = vld [vmem:[%s1299_s2 + $0x8] sm:$0xff]  ;;  %v338_v39 = vperm.slane %v224_v38, 0  ;;  %v359_v41 = vperm.slane %v224_v38, 3  ;;  %v352_v42 = vperm.slane %v224_v38, 2 }
  0x11   :  { %840 = vset.pattern.permute.xlu1 %v228_v12  ;;  %839 = vset.pattern.permute.xlu0 %v228_v12  ;;  %v222_v14 = vld [vmem:[%s1299_s2] sm:$0xff]  ;;  %v282_v29 = vperm.slane %v223_v28, 0  ;;  %v296_v32 = vperm.slane %v223_v28, 2  ;;  %v289_v33 = vperm.slane %v223_v28, 1  ;;  %v303_v34 = vperm.slane %v223_v28, 3  ;;  %v225_v45 = vld [vmem:[%s1299_s2 + $0x18] sm:$0xff] }
  0x12   :  { %159 = vmatpush.msra.mxu1 %v128_v8  ;;  %841 = vset.pattern.permute.xlu2 %v228_v12  ;;  %v240_v16 = vperm.slane %v222_v14, 2  ;;  %v226_v17 = vperm.slane %v222_v14, 0  ;;  %v254_v18 = vperm.slane %v222_v14, 4  ;;  %v247_v21 = vperm.slane %v222_v14, 3  ;;  %v123_v61 = vld [vmem:[%s1298_s1] sm:$0xff]  ;;  %v124_v62 = vld [vmem:[%s1298_s1 + $0x8] sm:$0xff] }
  0x13   :  { %v233_v22 = vperm.slane %v222_v14, 1  ;;  %v261_v23 = vperm.slane %v222_v14, 5  ;;  %v275_v26 = vperm.slane %v222_v14, 7  ;;  %v268_v27 = vperm.slane %v222_v14, 6  ;;  %v125_v63 = vld [vmem:[%s1298_s1 + $0x10] sm:$0xff]  ;;  %v126_v0 = vld [vmem:[%s1298_s1 + $0x18] sm:$0xff] }
  0x14   :  { %160 = vmatpush.msra.mxu1 %v127_v9  ;;  %v317_v35 = vperm.slane %v223_v28, 5  ;;  %v310_v36 = vperm.slane %v223_v28, 4  ;;  %v324_v37 = vperm.slane %v223_v28, 6  ;;  %v331_v40 = vperm.slane %v223_v28, 7  ;;  %v738_v28 = vld [vmem:[#allocation2] sm:$0xff] }
  0x15   :  { %v380_v43 = vperm.slane %v224_v38, 6  ;;  %v373_v44 = vperm.slane %v224_v38, 5  ;;  %v401_v46 = vperm.slane %v225_v45, 1  ;;  %v394_v47 = vperm.slane %v225_v45, 0 }
  0x16   :  { %v422_v48 = vperm.slane %v225_v45, 4  ;;  %v415_v49 = vperm.slane %v225_v45, 3  ;;  %v345_v50 = vperm.slane %v224_v38, 1  ;;  %v443_v51 = vperm.slane %v225_v45, 7 }
  0x17   :  { %v436_v52 = vperm.slane %v225_v45, 6  ;;  %v366_v53 = vperm.slane %v224_v38, 4  ;;  %v387_v54 = vperm.slane %v224_v38, 7  ;;  %v408_v55 = vperm.slane %v225_v45, 2 }
  0x18   :  { %821 = vmatmul.msk.f32.gmra.mxu0 %vm81_vm0, %v72_v5  ;;  %v429_v57 = vperm.slane %v225_v45, 5 }
  0x19   :  { %245 = vperm.xlu1 %840, %v240_v16   ;;  %231 = vperm.xlu0 %839, %v226_v17  }
  0x1a   :  { %259 = vperm.xlu2 %841, %v254_v18  }
  0x20   :  { %822 = vmatmul.msk.f32.gmra.mxu0 %vm81_vm0, %v73_v6 }
  0x21   :  { %252 = vperm.xlu1 %840, %v247_v21   ;;  %238 = vperm.xlu0 %839, %v233_v22  }
  0x22   :  { %266 = vperm.xlu2 %841, %v261_v23  }
  0x28   :  { %823 = vmatmul.msk.f32.gmra.mxu0 %vm81_vm0, %v74_v7 }
  0x29   :  { %280 = vperm.xlu1 %840, %v275_v26   ;;  %273 = vperm.xlu0 %839, %v268_v27   ;;  %v1109_v26 = vld [vmem:[%s1303_s6] ss:$0 sm:$0xff]  ;;  %v739_v27 = vld [vmem:[#allocation2 + $0x8] sm:$0xff] }
  0x2a   :  { %287 = vperm.xlu2 %841, %v282_v29  }
  0x31   :  { %301 = vperm.xlu1 %840, %v296_v32   ;;  %294 = vperm.xlu0 %839, %v289_v33  }
  0x32   :  { %308 = vperm.xlu2 %841, %v303_v34  }
  0x39   :  { %322 = vperm.xlu1 %840, %v317_v35   ;;  %315 = vperm.xlu0 %839, %v310_v36  }
  0x3a   :  { %329 = vperm.xlu2 %841, %v324_v37  }
  0x41   :  { %343 = vperm.xlu1 %840, %v338_v39   ;;  %336 = vperm.xlu0 %839, %v331_v40  }
  0x42   :  { %350 = vperm.xlu2 %841, %v345_v50  }
  0x49   :  { %364 = vperm.xlu1 %840, %v359_v41   ;;  %357 = vperm.xlu0 %839, %v352_v42  }
  0x4a   :  { %371 = vperm.xlu2 %841, %v366_v53  }
  0x51   :  { %385 = vperm.xlu1 %840, %v380_v43   ;;  %378 = vperm.xlu0 %839, %v373_v44  }
  0x52   :  { %392 = vperm.xlu2 %841, %v387_v54  }
  0x59   :  { %406 = vperm.xlu1 %840, %v401_v46   ;;  %399 = vperm.xlu0 %839, %v394_v47  }
  0x5a   :  { %413 = vperm.xlu2 %841, %v408_v55  }
  0x61   :  { %427 = vperm.xlu1 %840, %v422_v48   ;;  %420 = vperm.xlu0 %839, %v415_v49  }
  0x62   :  { %434 = vperm.xlu2 %841, %v429_v57  }
  0x69   :  { %448 = vperm.xlu1 %840, %v443_v51   ;;  %441 = vperm.xlu0 %839, %v436_v52  }
  0x74   :  { %v1066_v4 = vpop.permute.xlu2 %259 }
  0x75   :  { %vm454_vm6 = vcmp.gt.f32.partialorder %v1066_v4, 0.5 }
  0x7c   :  { %v1072_v7 = vpop.permute.xlu2 %266 }
  0x7d   :  { %vm455_vm9 = vcmp.gt.f32.partialorder %v1072_v7, 0.5 }
  0x84   :  { %v1078_v10 = vpop.permute.xlu2 %287 }
  0x85   :  { %vm458_vm11 = vcmp.gt.f32.partialorder %v1078_v10, 0.5 }
  0x8b   :  { %v1060_v1 = vpop.permute.xlu0 %231  ;;  %v1062_v2 = vpop.permute.xlu1 %245 }
  0x8c   :  { %vm452_vm2 = vcmp.gt.f32.partialorder %v1062_v2, 0.5  ;;  %vm450_vm3 = vcmp.gt.f32.partialorder %v1060_v1, 0.5 }
  0x8d   :  { %v111_v13 = vpop.f32.mrf.mxu0 }
  0x8e   :  { %v112_v15 = vadd.f32 %v842_v11, %v111_v13  ;;  %v1084_v13 = vpop.permute.xlu2 %308 }
  0x90   :  { %824 = vmatmul.msk.f32.vlgmr.msra.gmra.mxu1 %vm1309_vm1, %v112_v15 }
  0x93   :  { %v1064_v3 = vpop.permute.xlu0 %238  ;;  %v1068_v5 = vpop.permute.xlu1 %252 }
  0x94   :  { %vm453_vm4 = vcmp.gt.f32.partialorder %v1068_v5, 0.5  ;;  %vm451_vm5 = vcmp.gt.f32.partialorder %v1064_v3, 0.5 }
  0x95   :  { %v114_v19 = vpop.f32.mrf.mxu0 }
  0x96   :  { %v115_v20 = vadd.f32 %v842_v11, %v114_v19  ;;  %v1090_v16 = vpop.permute.xlu2 %329 }
  0x98   :  { %825 = vmatmul.msk.f32.gmra.mxu1 %vm1309_vm1, %v115_v20 }
  0x9b   :  { %v1070_v6 = vpop.permute.xlu0 %273  ;;  %v1074_v8 = vpop.permute.xlu1 %280 }
  0x9c   :  { %vm457_vm7 = vcmp.gt.f32.partialorder %v1074_v8, 0.5  ;;  %vm456_vm8 = vcmp.gt.f32.partialorder %v1070_v6, 0.5 }
  0x9d   :  { %v117_v24 = vpop.f32.mrf.mxu0 }
  0x9e   :  { %v118_v25 = vadd.f32 %v842_v11, %v117_v24  ;;  %v1096_v19 = vpop.permute.xlu2 %350  ;;  %v741_v24 = vld [vmem:[#allocation2 + $0x18] sm:$0xff] }
  0x9f   :  { %761 = vmatpush.msra.mxu3 %v741_v24 }
  0xa0   :  { %826 = vmatmul.msk.f32.gmra.mxu1 %vm1309_vm1, %v118_v25  ;;  %v740_v25 = vld [vmem:[#allocation2 + $0x10] sm:$0xff] }
  0xa1   :  { %762 = vmatpush.msra.mxu3 %v740_v25 }
  0xa3   :  { %v1076_v9 = vpop.permute.xlu0 %294  ;;  %763 = vmatpush.msra.mxu3 %v739_v27 }
  0xa4   :  { %vm459_vm13 = vcmp.gt.f32.partialorder %v1076_v9, 0.5 }
  0xa5   :  { %v120_v30 = vpop.f32.mrf.mxu0  ;;  %764 = vmatpush.msra.mxu3 %v738_v28 }
  0xa6   :  { %v121_v31 = vadd.f32 %v842_v11, %v120_v30  ;;  %v1080_v11 = vpop.permute.xlu1 %301  ;;  %v1102_v22 = vpop.permute.xlu2 %371 }
  0xa7   :  { %vm460_vm12 = vcmp.gt.f32.partialorder %v1080_v11, 0.5 }
  0xa8   :  { %827 = vmatmul.msk.f32.gmra.mxu1 %vm1309_vm1, %v121_v31 }
  0xab   :  { %v1082_v12 = vpop.permute.xlu0 %315 }
  0xac   :  { %vm462_vm0 = vcmp.gt.f32.partialorder %v1082_v12, 0.5 }
  0xae   :  { %v1086_v14 = vpop.permute.xlu1 %322  ;;  %v1116_v32 = vpop.permute.xlu2 %392 }
  0xaf   :  { %vm463_vm15 = vcmp.gt.f32.partialorder %v1086_v14, 0.5  ;;  %v773_v14 = vld [vmem:[#allocation5 + $0x18] sm:$0xff] }
  0xb0   :  { %793 = vmatpush.msrb.mxu3 %v773_v14 }
  0xb3   :  { %v1088_v15 = vpop.permute.xlu0 %336 }
  0xb4   :  { %vm465_vm14 = vcmp.gt.f32.partialorder %v1088_v15, 0.5 }
  0xb6   :  { %v1092_v17 = vpop.permute.xlu1 %343 }
  0xbb   :  { %v1094_v18 = vpop.permute.xlu0 %357 }
  0xbe   :  { %v1098_v20 = vpop.permute.xlu1 %364 }
  0xc3   :  { %v1100_v21 = vpop.permute.xlu0 %378 }
  0xc6   :  { %v1104_v23 = vpop.permute.xlu1 %385 }
  0xcb   :  { %v1114_v31 = vpop.permute.xlu0 %399 }
  0xce   :  { %v1121_v33 = vpop.permute.xlu1 %406 }
  0xd6   :  { %v1173_v5 = vpop.permute.xlu1 %427 }
 0x10d   :  { %v162_v56 = vpop.f32.mrf.mxu1 }
 0x115   :  { %v165_v58 = vpop.f32.mrf.mxu1 }
 0x11d   :  { %v168_v59 = vpop.f32.mrf.mxu1 }
 0x125   :  { %v171_v60 = vpop.f32.mrf.mxu1 }
 0x126   :  { %201 = vmatpush.msra.mxu2 %v171_v60 }
 0x128   :  { %202 = vmatpush.msra.mxu2 %v168_v59 }
 0x12a   :  { %203 = vmatpush.msra.mxu2 %v165_v58 }
 0x12c   :  { %204 = vmatpush.msra.mxu2 %v162_v56 }
 0x12d   :  { %828 = vmatmul.msk.f32.vlgmr.msra.gmra.mxu2 %vm1309_vm1, %v123_v61 }
 0x135   :  { %829 = vmatmul.msk.f32.gmra.mxu2 %vm1309_vm1, %v124_v62 }
 0x13d   :  { %830 = vmatmul.msk.f32.gmra.mxu2 %vm1309_vm1, %v125_v63  ;;  %v1157_v63 = vpop.permute.xlu0 %420 }
 0x145   :  { %831 = vmatmul.msk.f32.gmra.mxu2 %vm1309_vm1, %v126_v0  ;;  %vm464_vm1 = vcmp.gt.f32.partialorder %v1090_v16, 0.5  ;;  %v1159_v0 = vpop.permute.xlu2 %413 }
 0x1b0   :  { %v206_v29 = vpop.f32.mrf.mxu2 }
 0x1b1   :  { %v207_v30 = vadd.f32 %v1109_v26, %v206_v29 }
 0x1b3   :  { %v218_v34 = vmax.f32 %v207_v30, 0.0 }
 0x1b5   :  { %v486_v35 = vrot.slane %v218_v34, 1  ;;  %v487_v36 = vrot.slane %v218_v34, 2  ;;  %v488_v37 = vrot.slane %v218_v34, 3  ;;  %v489_v38 = vrot.slane %v218_v34, 4 }
 0x1b6   :  { %v490_v39 = vrot.slane %v218_v34, 5  ;;  %v491_v40 = vrot.slane %v218_v34, 6  ;;  %v492_v41 = vrot.slane %v218_v34, 7  ;;  %v578_v42 = vperm.slane %v218_v34, 0 }
 0x1b7   :  { %v579_v43 = vperm.slane %v486_v35, 0  ;;  %v580_v44 = vperm.slane %v487_v36, 0  ;;  %v581_v45 = vperm.slane %v488_v37, 0  ;;  %v582_v46 = vperm.slane %v489_v38, 0 }
 0x1b8   :  { %v209_v47 = vpop.f32.mrf.mxu2  ;;  %v583_v48 = vperm.slane %v490_v39, 0  ;;  %v584_v49 = vperm.slane %v491_v40, 0  ;;  %v585_v50 = vperm.slane %v492_v41, 0  ;;  %v642_v51 = vsel %vm450_vm3, %v578_v42, -1e+30 }
 0x1b9   :  { %v210_v52 = vadd.f32 %v1109_v26, %v209_v47  ;;  %v643_v53 = vsel %vm451_vm5, %v579_v43, -1e+30  ;;  %v644_v54 = vsel %vm452_vm2, %v580_v44, -1e+30  ;;  %v645_v55 = vsel %vm453_vm4, %v581_v45, -1e+30 }
 0x1ba   :  { %v646_v56 = vsel %vm454_vm6, %v582_v46, -1e+30  ;;  %v647_v57 = vsel %vm455_vm9, %v583_v48, -1e+30  ;;  %v648_v58 = vsel %vm456_vm8, %v584_v49, -1e+30 }
 0x1bb   :  { %v219_v59 = vmax.f32 %v210_v52, 0.0  ;;  %v649_v60 = vsel %vm457_vm7, %v585_v50, -1e+30  ;;  %v1152_v61 = vsel %vm674_vm10, %v642_v51, -inf  ;;  %v1155_v62 = vsel %vm674_vm10, %v643_v53, -inf  ;;  %v772_v49 = vld [vmem:[#allocation5 + $0x10] sm:$0xff] }
 0x1bc   :  { %v1162_v1 = vsel %vm674_vm10, %v644_v54, -inf  ;;  %v1165_v2 = vsel %vm674_vm10, %v645_v55, -inf  ;;  %v1168_v3 = vsel %vm674_vm10, %v646_v56, -inf  ;;  %v1171_v4 = vsel %vm674_vm10, %v647_v57, -inf  ;;  %v1218_v56 = vpop.permute.xlu0 %441  ;;  %v435_v57 = vpop.permute.xlu2 %434  ;;  %794 = vmatpush.msrb.mxu3 %v772_v49 }
 0x1bd   :  { %v493_v6 = vrot.slane %v219_v59, 1  ;;  %v494_v7 = vrot.slane %v219_v59, 2  ;;  %v495_v8 = vrot.slane %v219_v59, 3  ;;  %v496_v24 = vrot.slane %v219_v59, 4 }
 0x1be   :  { %v497_v25 = vrot.slane %v219_v59, 5  ;;  %v498_v27 = vrot.slane %v219_v59, 6  ;;  %v499_v28 = vrot.slane %v219_v59, 7  ;;  %v586_v29 = vperm.slane %v219_v59, 0 }
 0x1bf   :  { %vm466_vm2 = vcmp.gt.f32.partialorder %v1092_v17, 0.5  ;;  %v587_v30 = vperm.slane %v493_v6, 0  ;;  %v588_v34 = vperm.slane %v494_v7, 0  ;;  %v589_v35 = vperm.slane %v495_v8, 0 }
 0x1c0   :  { %v590_v36 = vperm.slane %v496_v24, 0  ;;  %vm468_vm4 = vcmp.gt.f32.partialorder %v1094_v18, 0.5  ;;  %vm467_vm5 = vcmp.gt.f32.partialorder %v1096_v19, 0.5  ;;  %v212_v37 = vpop.f32.mrf.mxu2  ;;  %v591_v38 = vperm.slane %v497_v25, 0 }
 0x1c1   :  { %v592_v39 = vperm.slane %v498_v27, 0  ;;  %v593_v40 = vperm.slane %v499_v28, 0  ;;  %v650_v41 = vsel %vm458_vm11, %v586_v29, -1e+30  ;;  %vm472_vm6 = vcmp.gt.f32.partialorder %v1104_v23, 0.5 }
 0x1c2   :  { %vm471_vm7 = vcmp.gt.f32.partialorder %v1100_v21, 0.5  ;;  %vm470_vm8 = vcmp.gt.f32.partialorder %v1102_v22, 0.5  ;;  %v213_v42 = vadd.f32 %v1109_v26, %v212_v37  ;;  %v651_v43 = vsel %vm459_vm13, %v587_v30, -1e+30 }
 0x1c3   :  { %v652_v44 = vsel %vm460_vm12, %v588_v34, -1e+30  ;;  %vm1310_vm9 = vcmp.gt.f32.partialorder %v1084_v13, 0.5  ;;  %vm473_vm3 = vcmp.gt.f32.partialorder %v1116_v32, 0.5  ;;  %v654_v10 = vsel %vm462_vm0, %v590_v36, -1e+30 }
 0x1c4   :  { %v653_v45 = vsel %vm1310_vm9, %v589_v35, -1e+30  ;;  %v655_v46 = vsel %vm463_vm15, %v591_v38, -1e+30  ;;  %v1198_v47 = vsel %vm464_vm1, %v592_v39, -1e+30  ;;  %v680_v9 = vmax.f32 %v1152_v61, %v1168_v3 }
 0x1c5   :  { %v220_v11 = vmax.f32 %v213_v42, 0.0  ;;  %v1204_v13 = vsel %vm465_vm14, %v593_v40, -1e+30  ;;  %v682_v48 = vmax.f32 %v1155_v62, %v1171_v4  ;;  %v1209_v12 = vsel %vm674_vm10, %v648_v58, -inf }
 0x1c6   :  { %v684_v16 = vmax.f32 %v1162_v1, %v1209_v12  ;;  %v1214_v50 = vsel %vm674_vm10, %v649_v60, -inf  ;;  %v687_v51 = vsel %vm674_vm10, %v650_v41, -inf  ;;  %v689_v15 = vsel %vm674_vm10, %v651_v43, -inf  ;;  %v449_v60 = vpop.permute.xlu1 %448 }
 0x1c7   :  { %v500_v52 = vrot.slane %v220_v11, 1  ;;  %v501_v53 = vrot.slane %v220_v11, 2  ;;  %v502_v54 = vrot.slane %v220_v11, 3  ;;  %v503_v55 = vrot.slane %v220_v11, 4 }
 0x1c8   :  { %v504_v58 = vrot.slane %v220_v11, 5  ;;  %v505_v59 = vrot.slane %v220_v11, 6  ;;  %v506_v61 = vrot.slane %v220_v11, 7  ;;  %v594_v62 = vperm.slane %v220_v11, 0  ;;  %v215_v8 = vpop.f32.mrf.mxu2 }
 0x1c9   :  { %vm474_vm1 = vcmp.gt.f32.partialorder %v1114_v31, 0.5  ;;  %v595_v3 = vperm.slane %v500_v52, 0  ;;  %v596_v4 = vperm.slane %v501_v53, 0  ;;  %v597_v6 = vperm.slane %v502_v54, 0 }
 0x1ca   :  { %v598_v7 = vperm.slane %v503_v55, 0  ;;  %vm475_vm11 = vcmp.gt.f32.partialorder %v1121_v33, 0.5  ;;  %vm476_vm13 = vcmp.gt.f32.partialorder %v1159_v0, 0.5  ;;  %v599_v24 = vperm.slane %v504_v58, 0 }
 0x1cb   :  { %v600_v25 = vperm.slane %v505_v59, 0  ;;  %v601_v27 = vperm.slane %v506_v61, 0  ;;  %v658_v28 = vsel %vm466_vm2, %v594_v62, -1e+30  ;;  %vm478_vm14 = vcmp.gt.f32.partialorder %v1173_v5, 0.5 }
 0x1cc   :  { %vm480_vm15 = vcmp.gt.f32.partialorder %v1218_v56, 0.5  ;;  %vm479_vm0 = vcmp.gt.f32.partialorder %v435_v57, 0.5  ;;  %v216_v29 = vadd.f32 %v1109_v26, %v215_v8  ;;  %v659_v30 = vsel %vm467_vm5, %v595_v3, -1e+30 }
 0x1cd   :  { %v660_v34 = vsel %vm468_vm4, %v596_v4, -1e+30  ;;  %vm1311_vm9 = vcmp.gt.f32.partialorder %v1098_v20, 0.5  ;;  %vm481_vm12 = vcmp.gt.f32.partialorder %v449_v60, 0.5  ;;  %v662_v17 = vsel %vm470_vm8, %v598_v7, -1e+30 }
 0x1ce   :  { %v661_v35 = vsel %vm1311_vm9, %v597_v6, -1e+30  ;;  %v663_v36 = vsel %vm471_vm7, %v599_v24, -1e+30  ;;  %v664_v37 = vsel %vm472_vm6, %v600_v25, -1e+30  ;;  %v686_v19 = vmax.f32 %v1165_v2, %v1214_v50 }
 0x1cf   :  { %v221_v26 = vmax.f32 %v216_v29, 0.0  ;;  %v665_v18 = vsel %vm473_vm3, %v601_v27, -1e+30  ;;  %v688_v38 = vmax.f32 %v680_v9, %v687_v51  ;;  %v690_v20 = vmax.f32 %v682_v48, %v689_v15 }
 0x1d0   :  { %v691_v39 = vsel %vm674_vm10, %v652_v44, -inf  ;;  %v693_v22 = vsel %vm674_vm10, %v653_v45, -inf  ;;  %v695_v40 = vsel %vm674_vm10, %v654_v10, -inf  ;;  %v697_v21 = vsel %vm674_vm10, %v655_v46, -inf }
 0x1d1   :  { %v507_v41 = vrot.slane %v221_v26, 1  ;;  %v508_v23 = vrot.slane %v221_v26, 2  ;;  %v509_v42 = vrot.slane %v221_v26, 3  ;;  %v510_v43 = vrot.slane %v221_v26, 4 }
 0x1d2   :  { %v511_v11 = vrot.slane %v221_v26, 5  ;;  %v512_v2 = vrot.slane %v221_v26, 6  ;;  %v513_v14 = vrot.slane %v221_v26, 7  ;;  %v602_v49 = vperm.slane %v221_v26, 0 }
 0x1d3   :  { %v603_v32 = vperm.slane %v507_v41, 0  ;;  %v604_v50 = vperm.slane %v508_v23, 0  ;;  %v605_v9 = vperm.slane %v509_v42, 0  ;;  %v606_v48 = vperm.slane %v510_v43, 0  ;;  %v771_v42 = vld [vmem:[#allocation5 + $0x8] sm:$0xff]  ;;  %v770_v43 = vld [vmem:[#allocation5] sm:$0xff] }
 0x1d4   :  { %v607_v51 = vperm.slane %v511_v11, 0  ;;  %v608_v44 = vperm.slane %v512_v2, 0  ;;  %v609_v15 = vperm.slane %v513_v14, 0  ;;  %v666_v45 = vsel %vm474_vm1, %v602_v49, -1e+30  ;;  %795 = vmatpush.msrb.mxu3 %v771_v42 }
 0x1d5   :  { %v667_v10 = vsel %vm475_vm11, %v603_v32, -1e+30  ;;  %v668_v46 = vsel %vm476_vm13, %v604_v50, -1e+30  ;;  %vm1312_vm2 = vcmp.gt.f32.partialorder %v1157_v63, 0.5  ;;  %v692_v53 = vmax.f32 %v684_v16, %v691_v39 }
 0x1d6   :  { %v669_v52 = vsel %vm1312_vm2, %v605_v9, -1e+30  ;;  %v670_v54 = vsel %vm478_vm14, %v606_v48, -1e+30  ;;  %v671_v55 = vsel %vm479_vm0, %v607_v51, -1e+30  ;;  %v694_v33 = vmax.f32 %v686_v19, %v693_v22  ;;  %796 = vmatpush.msrb.mxu3 %v770_v43 }
 0x1d7   :  { %v672_v31 = vsel %vm480_vm15, %v608_v44, -1e+30  ;;  %v673_v58 = vsel %vm481_vm12, %v609_v15, -1e+30  ;;  %v696_v0 = vmax.f32 %v688_v38, %v695_v40  ;;  %v698_v59 = vmax.f32 %v690_v20, %v697_v21  ;;  %v844_v11 = vld [vmem:[%s1305_s8] ss:$0 sm:$0xff] }
 0x1d8   :  { %v699_v63 = vsel %vm674_vm10, %v1198_v47, -inf  ;;  %v701_v1 = vsel %vm674_vm10, %v1204_v13, -inf  ;;  %v703_v5 = vsel %vm674_vm10, %v658_v28, -inf  ;;  %v705_v12 = vsel %vm674_vm10, %v659_v30, -inf  ;;  %v845_v32 = vld [vmem:[%s1307_s10] ss:$0 sm:$0xff] }
 0x1d9   :  { %v700_v61 = vmax.f32 %v692_v53, %v699_v63  ;;  %v702_v16 = vmax.f32 %v694_v33, %v701_v1  ;;  %v704_v57 = vmax.f32 %v696_v0, %v703_v5  ;;  %v706_v56 = vmax.f32 %v698_v59, %v705_v12 }
 0x1da   :  { %v707_v62 = vsel %vm674_vm10, %v660_v34, -inf  ;;  %v709_v3 = vsel %vm674_vm10, %v661_v35, -inf  ;;  %v711_v4 = vsel %vm674_vm10, %v662_v17, -inf  ;;  %v713_v47 = vsel %vm674_vm10, %v663_v36, -inf }
 0x1db   :  { %v708_v60 = vmax.f32 %v700_v61, %v707_v62  ;;  %v710_v6 = vmax.f32 %v702_v16, %v709_v3  ;;  %v712_v7 = vmax.f32 %v704_v57, %v711_v4  ;;  %v714_v8 = vmax.f32 %v706_v56, %v713_v47 }
 0x1dc   :  { %v715_v13 = vsel %vm674_vm10, %v664_v37, -inf  ;;  %v717_v25 = vsel %vm674_vm10, %v665_v18, -inf  ;;  %v719_v27 = vsel %vm674_vm10, %v666_v45, -inf  ;;  %v721_v28 = vsel %vm674_vm10, %v667_v10, -inf }
 0x1dd   :  { %v716_v24 = vmax.f32 %v708_v60, %v715_v13  ;;  %v718_v29 = vmax.f32 %v710_v6, %v717_v25  ;;  %v720_v30 = vmax.f32 %v712_v7, %v719_v27  ;;  %v722_v34 = vmax.f32 %v714_v8, %v721_v28 }
 0x1de   :  { %v723_v35 = vsel %vm674_vm10, %v668_v46, -inf  ;;  %v725_v36 = vsel %vm674_vm10, %v669_v52, -inf  ;;  %v727_v19 = vsel %vm674_vm10, %v670_v54, -inf  ;;  %v729_v26 = vsel %vm674_vm10, %v671_v55, -inf }
 0x1df   :  { %v724_v17 = vmax.f32 %v716_v24, %v723_v35  ;;  %v726_v37 = vmax.f32 %v718_v29, %v725_v36  ;;  %v728_v38 = vmax.f32 %v720_v30, %v727_v19  ;;  %v730_v20 = vmax.f32 %v722_v34, %v729_v26 }
 0x1e0   :  { %v731_v18 = vsel %vm674_vm10, %v672_v31, -inf  ;;  %v733_v22 = vsel %vm674_vm10, %v673_v58, -inf  ;;  %vm1313_vm3 = vcmask 261120  }
 0x1e1   :  { %v732_v39 = vmax.f32 %v724_v17, %v731_v18  ;;  %v734_v40 = vmax.f32 %v726_v37, %v733_v22  ;;  %v735_v21 = vmax.f32 %v728_v38, %v730_v20  ;;  %vm1314_vm4 = vmmov %vm1313_vm3 }
 0x1e3   :  { %v736_v41 = vmax.f32 %v732_v39, %v734_v40 }
 0x1e5   :  { %v737_v23 = vmax.f32 %v735_v21, %v736_v41 }
 0x1e7   :  { %832 = vmatmul.msk.f32.vlgmr.msra.gmra.mxu3 %vm1313_vm3, %v737_v23 }
 0x26a   :  { %v766_v2 = vpop.f32.mrf.mxu3 }
 0x26b   :  { %v767_v14 = vadd.f32 %v844_v11, %v766_v2 }
 0x26d   :  { %v769_v49 = vmax.f32 %v767_v14, 0.0 }
 0x26f   :  { %833 = vmatmul.msk.f32.vlgmr.msrb.gmra.mxu3 %vm1314_vm4, %v769_v49 }
 0x2f2   :  { %v798_v50 = vpop.f32.mrf.mxu3 }
 0x2f3   :  { %v799_v9 = vadd.f32 %v845_v32, %v798_v50 }
 0x2f5   :  { %801 = vst [vmem:[#allocation7] sm:$0x3] %v799_v9 }
 0x2f6   :  { %812 = dma.vmem_to_hbm [thread:$0]  %s808_s24, 32, %s810_s27, [#allocation4]  }
 0x2f7   :  { %922 = dma.done.wait [#allocation4], 32  }
 0x2f8   :  { %923 = vsyncadd [#allocation4], 4294967264 }
 0x2f9   :  { %817 = vsyncpa [#allocation3], 1 }
 0x2fa   :  { %818 = vsyncpa [#allocation6], 1 }
 0x2fb   :  { %819 = vsyncpa [#allocation4], 1 }

</bundles_post_ra>
